<compile_context>
chip_gen: v7x
topology: tpu7x:2x2x1
jax: 0.10.0
libtpu: 0.0.40
codegen_flags: <defaults>
</compile_context>

<pallas_src>
import jax
import jax.numpy as jnp
from jax.experimental import pallas as pl
from jax.experimental.pallas import tpu as pltpu


def _cdiv(a: int, b: int) -> int:
    return -(-a // b)


def _round_up(x: int, m: int) -> int:
    return _cdiv(x, m) * m


def _sublane(dtype) -> int:
    # 8 sublanes per vreg for 4-byte dtypes, 16 for 2-byte, 32 for 1-byte.
    itemsize = jnp.dtype(dtype).itemsize
    return 8 * max(1, 4 // itemsize)


def _mask_min(dtype):
    """A value <= every representable value of `dtype` (used only in-kernel)."""
    dtype = jnp.dtype(dtype)
    if jnp.issubdtype(dtype, jnp.floating):
        # Finite-only float8 variants (e.g. e4m3fn) have no -inf.
        if "float8" in dtype.name and dtype.name.endswith("fn"):
            return float(jnp.finfo(dtype).min)
        return float("-inf")
    if jnp.issubdtype(dtype, jnp.integer):
        return int(jnp.iinfo(dtype).min)
    raise TypeError(f"unsupported dtype for max reduction: {dtype}")


def _fold_lane_max(x):
    """(tn, m) -> (tn, 1) row max.

    Fold 128-lane chunks with VPU maximums first, then do a single cross-lane
    (XLU) reduce on the final <=128-lane slab, so there is exactly one XLU
    reduce per result vreg (keeps the kernel DMA-bound on v7x/v6e).
    """
    m = x.shape[-1]
    if m <= 128:
        return jnp.max(x, axis=-1, keepdims=True)
    nfull = m // 128
    acc = x[:, 0:128]
    for c in range(1, nfull):
        acc = jnp.maximum(acc, x[:, c * 128:(c + 1) * 128])
    out = jnp.max(acc, axis=-1, keepdims=True)
    rem = m - nfull * 128
    if rem:
        # 128-aligned start; partial-vreg cross-lane reduce on the tail.
        out = jnp.maximum(out, jnp.max(x[:, nfull * 128:], axis=-1, keepdims=True))
    return out


def _rowmax_kernel(w_ref, o_ref):
    # w_ref: (tn, M) tile; o_ref: (tn, 1) tile.  Reduce in the native dtype.
    o_ref[...] = _fold_lane_max(w_ref[...])


def _make_rowmax_acc_kernel(tm: int, m_true: int, min_val):
    """Wide-M kernel: output block resident across the reduction (k) axis."""
    mask_needed = (m_true % tm) != 0

    def kernel(w_ref, o_ref):
        k = pl.program_id(1)
        x = w_ref[...]
        if mask_needed:
            # Tail lanes of the (partial) last reduction block hold garbage;
            # mask them so they never win the max.  All-true for other blocks.
            cols = k * tm + jax.lax.broadcasted_iota(jnp.int32, x.shape, 1)
            x = jnp.where(cols < m_true, x, jnp.asarray(min_val, x.dtype))
        blk = _fold_lane_max(x)

        @pl.when(k == 0)
        def _():
            o_ref[...] = blk  # init folded into the first reduction step

        @pl.when(k > 0)
        def _():
            o_ref[...] = jnp.maximum(o_ref[...], blk)

    return kernel


def correspondence_weighter_max(
    weights: jax.Array, *, tile_budget_bytes: int = 8 * 1024 * 1024
) -> jax.Array:
    """Pallas implementation of CorrespondenceWeighter(weighting='max').forward.

    Args:
      weights: (B, N, M) array.
    Returns:
      (B, N, 1) array, max over the last dim (matches
      torch.max(weights, dim=-1, keepdim=True)[0]).
    """
    B, N, M = weights.shape
    dtype = weights.dtype
    itemsize = jnp.dtype(dtype).itemsize
    sub = _sublane(dtype)

    rows = B * N
    w2 = weights.reshape(rows, M)  # free, contiguous reshape

    row_bytes = max(1, M * itemsize)
    rows_per_tile_budget = max(1, tile_budget_bytes // row_bytes)
    # Only fall back to the 2-D (reduction-tiled) grid when even ~32-row
    # full-M tiles would blow the budget.
    wide_m = rows_per_tile_budget < 32

    cost = pl.CostEstimate(
        flops=rows * M,
        transcendentals=0,
        bytes_accessed=rows * M * itemsize + rows * itemsize,
    )
    cparams = dict(vmem_limit_bytes=32 * 1024 * 1024)

    if not wide_m:
        # --- Common path: full-M tiles, row-tiled 1-D grid, no padding. ------
        tn_budget = max(sub, (rows_per_tile_budget // sub) * sub)
        # Prefer >= 8 grid steps (>= 4 per TC on v7x megacore / pipelining),
        # but keep tiles >= ~1 MiB so per-step overhead stays amortized.
        min_tile_rows = _round_up(max(1, _cdiv(1 << 20, row_bytes)), sub)
        tn_steps = _round_up(max(1, _cdiv(rows, 8)), sub)
        tn = min(tn_budget, max(min_tile_rows, tn_steps))
        tn = max(sub, min(tn, _round_up(rows, sub)))

        out = pl.pallas_call(
            _rowmax_kernel,
            out_shape=jax.ShapeDtypeStruct((rows, 1), dtype),
            grid=(pl.cdiv(rows, tn),),  # partial last block clipped by Pallas
            in_specs=[pl.BlockSpec((tn, M), lambda r: (r, 0))],
            out_specs=pl.BlockSpec((tn, 1), lambda r: (r, 0)),
            compiler_params=pltpu.CompilerParams(
                dimension_semantics=("parallel",), **cparams
            ),
            cost_estimate=cost,
        )(w2)
    else:
        # --- Wide-M path: tile the reduction axis too (no padding either). ---
        min_val = _mask_min(dtype)
        # Aim for ~256-row tiles; tm sized so tn*tm*itemsize ~= budget.
        tm = max(128, ((tile_budget_bytes // max(1, 256 * itemsize)) // 128) * 128)
        tm = min(tm, _round_up(M, 128))
        tn = max(sub, ((tile_budget_bytes // max(1, tm * itemsize)) // sub) * sub)
        tn = max(sub, min(tn, _round_up(rows, sub)))

        kernel = _make_rowmax_acc_kernel(tm, M, min_val)
        out = pl.pallas_call(
            kernel,
            out_shape=jax.ShapeDtypeStruct((rows, 1), dtype),
            grid=(pl.cdiv(rows, tn), pl.cdiv(M, tm)),  # reduction axis last
            in_specs=[pl.BlockSpec((tn, tm), lambda r, k: (r, k))],
            out_specs=pl.BlockSpec((tn, 1), lambda r, k: (r, 0)),
            compiler_params=pltpu.CompilerParams(
                dimension_semantics=("parallel", "arbitrary"), **cparams
            ),
            cost_estimate=cost,
        )(w2)

    return out.reshape(B, N, 1)


if __name__ == "__main__":
    key = jax.random.PRNGKey(0)

    # (batch, num_points, num_candidates) — default 'max' weighting.
    B, N, M = 2, 64, 256
    weights = jax.random.uniform(key, (B, N, M), dtype=jnp.float32)
    ref = jnp.max(weights, axis=-1, keepdims=True)
    out = jax.block_until_ready(correspondence_weighter_max(weights))
    assert out.shape == (B, N, 1), out.shape
    assert jnp.allclose(out, ref), "Pallas result mismatch (common path)"

    # Irregular row count and non-multiple-of-128 M -> partial last row block
    # (cdiv grid, no padding) + remainder branch of the two-stage lane fold.
    B2, N2, M2 = 2, 61, 300
    w_irr = jax.random.uniform(jax.random.PRNGKey(1), (B2, N2, M2), dtype=jnp.float32)
    ref_irr = jnp.max(w_irr, axis=-1, keepdims=True)
    out_irr = jax.block_until_ready(correspondence_weighter_max(w_irr))
    assert out_irr.shape == (B2, N2, 1), out_irr.shape
    assert jnp.allclose(out_irr, ref_irr), "Pallas result mismatch (partial row block)"

    # Wide-M path: tiny budget forces the reduction-tiled 2-D grid, and
    # M=300 (not a multiple of tm=128) exercises the in-kernel tail-lane mask.
    B3, N3, M3 = 2, 64, 300
    w_wide = jax.random.uniform(jax.random.PRNGKey(2), (B3, N3, M3), dtype=jnp.float32)
    ref_wide = jnp.max(w_wide, axis=-1, keepdims=True)
    out_wide = jax.block_until_ready(
        correspondence_weighter_max(w_wide, tile_budget_bytes=16 * 1024)
    )
    assert out_wide.shape == (B3, N3, 1), out_wide.shape
    assert jnp.allclose(out_wide, ref_wide), "Pallas result mismatch (wide-M path)"

    print("KERNEL_OK")
</pallas_src>

<mosaic_0001>
module attributes {stable_mosaic.version = 11 : i64} {
  func.func @_rowmax_kernel(%arg0: i32, %arg1: memref<128x256xf32, #tpu.memory_space<vmem>>, %arg2: memref<128x1xf32, #tpu.memory_space<vmem>>) attributes {dimension_semantics = [#tpu.dimension_semantics<parallel>], iteration_bounds = array<i64: 1>, scalar_prefetch = 0 : i64, scratch_operands = 0 : i64, tpu.core_type = #tpu.core_type<tc>, window_params = [{transform_indices = @transform_0, window_bounds = array<i64: 128, 256>}, {transform_indices = @transform_1, window_bounds = array<i64: 128, 1>}]} {
    %c0 = arith.constant 0 : index
    %c0_0 = arith.constant 0 : index
    %0 = vector.load %arg1[%c0, %c0_0] : memref<128x256xf32, #tpu.memory_space<vmem>>, vector<128x256xf32>
    %1 = vector.extract_strided_slice %0 {offsets = [0, 0], sizes = [128, 128], strides = [1, 1]} : vector<128x256xf32> to vector<128x128xf32>
    %2 = vector.extract_strided_slice %0 {offsets = [0, 128], sizes = [128, 128], strides = [1, 1]} : vector<128x256xf32> to vector<128x128xf32>
    %3 = arith.maximumf %1, %2 : vector<128x128xf32>
    %cst = arith.constant dense<0xFF800000> : vector<128xf32>
    %4 = vector.multi_reduction <maximumf>, %3, %cst [1] : vector<128x128xf32> to vector<128xf32>
    %5 = vector.shape_cast %4 : vector<128xf32> to vector<128x1xf32>
    %c0_1 = arith.constant 0 : index
    %c0_2 = arith.constant 0 : index
    %6 = vector.load %arg2[%c0_1, %c0_2] : memref<128x1xf32, #tpu.memory_space<vmem>>, vector<128x1xf32>
    tpu.vector_store %arg2[%c0_1, %c0_2], %5 {strides = array<i32>} : memref<128x1xf32, #tpu.memory_space<vmem>>, vector<128x1xf32>,
    return
  }
  func.func @transform_0(%arg0: i32) -> (i32, i32) {
    %c0_i32 = arith.constant 0 : i32
    %c0_i32_0 = arith.constant 0 : i32
    return %arg0, %c0_i32 : i32, i32
  }
  func.func @transform_1(%arg0: i32) -> (i32, i32) {
    %c0_i32 = arith.constant 0 : i32
    %c0_i32_0 = arith.constant 0 : i32
    return %arg0, %c0_i32 : i32, i32
  }
}

</mosaic_0001>

<bundles_post_ra>
// kernel: tpu_custom_call.1
= control target key start
LH: loop header
LB: loop body
LE: loop exit
PB: predicated region body
PF: predicated region fallthrough
CT: control target
= control target key end

     0   :  { %6 = vsyncpa [#allocation3], 0  ;;  %s151_s6 = smov [#allocation2]   ;;  %s240_s0 = inlined_call_operand.hbm [shape: f32[128,256], index: 0, kind: input, shape index: {}]   ;;  %s241_s1 = inlined_call_operand.vmem [shape: f32[128,1], index: 1, kind: output, shape index: {}]  }
   0x1   :  { %s12_s7 = sshll.u32 %s151_s6, 4  ;;  %s127_s10 = scalar_lea.hbm %s240_s0, 4096  ;;  %s13_s7 = int_to_ptr.vmem [resolvable:$true] %s12_s7 }
   0x2   :  { %p128_p0 = scmp.ne.s32.totalorder %s240_s0, %s127_s10  ;;  %p131_p1 = scmp.lt.u32.totalorder %s127_s10, %s240_s0 }
   0x4   :  { %p133_p2 = pnand %p131_p1, %p128_p0 }
   0x6   :  { %136 = shalt.err (!%p133_p2)
}
   0x7   :  { %s137_s15 = scalar_lea.vmem %s13_s7, 4096  ;;  %p142_p4 = scmp.lt.s32.totalorder %s13_s7, %s13_s7 }
   0x8   :  { %p138_p3 = scmp.ne.s32.totalorder %s13_s7, %s137_s15  ;;  %p143_p5 = scmp.lt.s32.totalorder %s137_s15, %s137_s15 }
   0xa   :  { %p144_p6 = por %p143_p5, %p142_p4 }
   0xc   :  { %p145_p7 = pnand %p144_p6, %p138_p3 }
   0xe   :  { %148 = shalt.err (!%p145_p7)
}
   0xf   :  { %s152_s16 = smov 256   ;;  %s153_s17 = smov 16  }
  0x10   :  { %18 = dma.hbm_to_vmem [thread:$0]  %s240_s0, 4096, %s13_s7, [#allocation3], %s152_s16, %s152_s16, %s153_s17  }
  0x11   :  { %149 = dma.done.wait [#allocation3], 4096  }
  0x12   :  { %150 = vsyncadd [#allocation3], 4294963200  ;;  %v26_v0 = vld [vmem:[#allocation2 + $0x20] sm:$0xff]  ;;  %v27_v1 = vld [vmem:[#allocation2 + $0x28] sm:$0xff]  ;;  %vm102_vm0 = vcmask 7168  }
  0x13   :  { %v22_v2 = vld [vmem:[#allocation2] sm:$0xff]  ;;  %v56_v3 = vmax.f32 %v26_v0, %v27_v1  ;;  %v23_v4 = vld [vmem:[#allocation2 + $0x8] sm:$0xff]  ;;  %v28_v5 = vld [vmem:[#allocation2 + $0x30] sm:$0xff] }
  0x14   :  { %v29_v6 = vld [vmem:[#allocation2 + $0x38] sm:$0xff]  ;;  %v54_v7 = vmax.f32 %v22_v2, %v23_v4  ;;  %v24_v8 = vld [vmem:[#allocation2 + $0x10] sm:$0xff]  ;;  %v30_v14 = vld [vmem:[#allocation2 + $0x40] sm:$0xff] }
  0x15   :  { %v25_v9 = vld [vmem:[#allocation2 + $0x18] sm:$0xff]  ;;  %74 = vmax.xlane.f32.xlu1 %v56_v3  ;;  %v57_v10 = vmax.f32 %v28_v5, %v29_v6  ;;  %v32_v12 = vld [vmem:[#allocation2 + $0x50] sm:$0xff]  ;;  %v31_v15 = vld [vmem:[#allocation2 + $0x48] sm:$0xff] }
  0x16   :  { %70 = vmax.xlane.f32.xlu0 %v54_v7  ;;  %v55_v11 = vmax.f32 %v24_v8, %v25_v9  ;;  %v33_v13 = vld [vmem:[#allocation2 + $0x58] sm:$0xff]  ;;  %v58_v17 = vmax.f32 %v30_v14, %v31_v15  ;;  %v36_v18 = vld [vmem:[#allocation2 + $0x70] sm:$0xff]  ;;  %v34_v20 = vld [vmem:[#allocation2 + $0x60] sm:$0xff] }
  0x17   :  { %v59_v16 = vmax.f32 %v32_v12, %v33_v13  ;;  %v37_v19 = vld [vmem:[#allocation2 + $0x78] sm:$0xff]  ;;  %v35_v21 = vld [vmem:[#allocation2 + $0x68] sm:$0xff]  ;;  %v40_v24 = vld [vmem:[#allocation2 + $0x90] sm:$0xff] }
  0x18   :  { %v61_v22 = vmax.f32 %v36_v18, %v37_v19  ;;  %v60_v23 = vmax.f32 %v34_v20, %v35_v21  ;;  %v41_v25 = vld [vmem:[#allocation2 + $0x98] sm:$0xff]  ;;  %v38_v26 = vld [vmem:[#allocation2 + $0x80] sm:$0xff]  ;;  %v39_v27 = vld [vmem:[#allocation2 + $0x88] sm:$0xff] }
  0x19   :  { %76 = vmax.xlane.f32.xlu1 %v57_v10  ;;  %v63_v28 = vmax.f32 %v40_v24, %v41_v25  ;;  %v62_v29 = vmax.f32 %v38_v26, %v39_v27  ;;  %v44_v30 = vld [vmem:[#allocation2 + $0xb0] sm:$0xff]  ;;  %v45_v31 = vld [vmem:[#allocation2 + $0xb8] sm:$0xff]  ;;  %v42_v32 = vld [vmem:[#allocation2 + $0xa0] sm:$0xff] }
  0x1a   :  { %72 = vmax.xlane.f32.xlu0 %v55_v11  ;;  %v43_v33 = vld [vmem:[#allocation2 + $0xa8] sm:$0xff]  ;;  %v65_v34 = vmax.f32 %v44_v30, %v45_v31  ;;  %v48_v36 = vld [vmem:[#allocation2 + $0xd0] sm:$0xff]  ;;  %v49_v37 = vld [vmem:[#allocation2 + $0xd8] sm:$0xff] }
  0x1b   :  { %v64_v35 = vmax.f32 %v42_v32, %v43_v33  ;;  %v46_v38 = vld [vmem:[#allocation2 + $0xc0] sm:$0xff]  ;;  %v47_v39 = vld [vmem:[#allocation2 + $0xc8] sm:$0xff]  ;;  %v67_v40 = vmax.f32 %v48_v36, %v49_v37  ;;  %v52_v42 = vld [vmem:[#allocation2 + $0xf0] sm:$0xff] }
  0x1c   :  { %v66_v41 = vmax.f32 %v46_v38, %v47_v39  ;;  %v53_v43 = vld [vmem:[#allocation2 + $0xf8] sm:$0xff]  ;;  %v50_v44 = vld [vmem:[#allocation2 + $0xe0] sm:$0xff]  ;;  %v51_v45 = vld [vmem:[#allocation2 + $0xe8] sm:$0xff] }
  0x1d   :  { %80 = vmax.xlane.f32.xlu1 %v59_v16  ;;  %v69_v46 = vmax.f32 %v52_v42, %v53_v43  ;;  %v68_v47 = vmax.f32 %v50_v44, %v51_v45 }
  0x1e   :  { %78 = vmax.xlane.f32.xlu0 %v58_v17 }
  0x21   :  { %84 = vmax.xlane.f32.xlu1 %v61_v22 }
  0x22   :  { %82 = vmax.xlane.f32.xlu0 %v60_v23 }
  0x25   :  { %88 = vmax.xlane.f32.xlu1 %v63_v28 }
  0x26   :  { %86 = vmax.xlane.f32.xlu0 %v62_v29 }
  0x29   :  { %92 = vmax.xlane.f32.xlu1 %v65_v34 }
  0x2a   :  { %90 = vmax.xlane.f32.xlu0 %v64_v35 }
  0x2d   :  { %96 = vmax.xlane.f32.xlu1 %v67_v40 }
  0x2e   :  { %94 = vmax.xlane.f32.xlu0 %v66_v41 }
  0x31   :  { %100 = vmax.xlane.f32.xlu1 %v69_v46 }
  0x32   :  { %98 = vmax.xlane.f32.xlu0 %v68_v47 }
  0xa2   :  { %v75_v48 = vpop.xlane.xlu1 %74 }
  0xa3   :  { %105 = vst.msk [vmem:[%s241_s1 + $0x10] sm:$0xff] %vm102_vm0, %v75_v48  ;;  %v71_v49 = vpop.xlane.xlu0 %70 }
  0xa4   :  { %103 = vst.msk [vmem:[%s241_s1] sm:$0xff] %vm102_vm0, %v71_v49 }
  0xa6   :  { %v77_v50 = vpop.xlane.xlu1 %76 }
  0xa7   :  { %106 = vst.msk [vmem:[%s241_s1 + $0x18] sm:$0xff] %vm102_vm0, %v77_v50  ;;  %v73_v51 = vpop.xlane.xlu0 %72 }
  0xa8   :  { %104 = vst.msk [vmem:[%s241_s1 + $0x8] sm:$0xff] %vm102_vm0, %v73_v51 }
  0xaa   :  { %v81_v52 = vpop.xlane.xlu1 %80 }
  0xab   :  { %108 = vst.msk [vmem:[%s241_s1 + $0x28] sm:$0xff] %vm102_vm0, %v81_v52  ;;  %v79_v53 = vpop.xlane.xlu0 %78 }
  0xac   :  { %107 = vst.msk [vmem:[%s241_s1 + $0x20] sm:$0xff] %vm102_vm0, %v79_v53 }
  0xae   :  { %v85_v54 = vpop.xlane.xlu1 %84 }
  0xaf   :  { %110 = vst.msk [vmem:[%s241_s1 + $0x38] sm:$0xff] %vm102_vm0, %v85_v54  ;;  %v83_v55 = vpop.xlane.xlu0 %82 }
  0xb0   :  { %109 = vst.msk [vmem:[%s241_s1 + $0x30] sm:$0xff] %vm102_vm0, %v83_v55 }
  0xb2   :  { %v89_v56 = vpop.xlane.xlu1 %88 }
  0xb3   :  { %112 = vst.msk [vmem:[%s241_s1 + $0x48] sm:$0xff] %vm102_vm0, %v89_v56  ;;  %v87_v57 = vpop.xlane.xlu0 %86 }
  0xb4   :  { %111 = vst.msk [vmem:[%s241_s1 + $0x40] sm:$0xff] %vm102_vm0, %v87_v57 }
  0xb6   :  { %v93_v58 = vpop.xlane.xlu1 %92 }
  0xb7   :  { %114 = vst.msk [vmem:[%s241_s1 + $0x58] sm:$0xff] %vm102_vm0, %v93_v58  ;;  %v91_v59 = vpop.xlane.xlu0 %90 }
  0xb8   :  { %113 = vst.msk [vmem:[%s241_s1 + $0x50] sm:$0xff] %vm102_vm0, %v91_v59 }
  0xba   :  { %v97_v60 = vpop.xlane.xlu1 %96 }
  0xbb   :  { %116 = vst.msk [vmem:[%s241_s1 + $0x68] sm:$0xff] %vm102_vm0, %v97_v60  ;;  %v95_v61 = vpop.xlane.xlu0 %94 }
  0xbc   :  { %115 = vst.msk [vmem:[%s241_s1 + $0x60] sm:$0xff] %vm102_vm0, %v95_v61 }
  0xbe   :  { %v101_v62 = vpop.xlane.xlu1 %100 }
  0xbf   :  { %118 = vst.msk [vmem:[%s241_s1 + $0x78] sm:$0xff] %vm102_vm0, %v101_v62  ;;  %v99_v63 = vpop.xlane.xlu0 %98 }
  0xc0   :  { %117 = vst.msk [vmem:[%s241_s1 + $0x70] sm:$0xff] %vm102_vm0, %v99_v63 }
  0xc1   :  { %123 = vsyncpa [#allocation3], 1 }

</bundles_post_ra>
